<compile_context>
chip_gen: v5e
topology: v5e:2x2
jax: 0.10.0
libtpu: 0.0.40
codegen_flags: <defaults>
</compile_context>

<pallas_src>
import functools

import numpy as np
import jax
import jax.numpy as jnp
from jax.experimental import pallas as pl
from jax.experimental.pallas import tpu as pltpu


def _round_up(v, m):
    return ((v + m - 1) // m) * m


def _cdiv(a, b):
    return (a + b - 1) // b


def _vmem_budget():
    """Returns (scoped VMEM budget to request, physical VMEM) in bytes."""
    phys = 64 << 20  # conservative default: v7x per-TensorCore VMEM
    try:
        phys = int(pltpu.get_tpu_info().vmem_capacity_bytes)
    except Exception:
        pass
    # Leave headroom for Mosaic internal scratch / semaphores / pipeline state:
    # ~102 MiB usable on v5e/v6e (128 MiB phys), ~51 MiB on v7x (64 MiB phys).
    return min(phys - (12 << 20), int(phys * 0.80)), phys


# ----------------------------------------------------------------------------
# Kernels
# ----------------------------------------------------------------------------
def _ei_dense_resident_kernel(x_ref, wcomb_ref, weiT_ref, b_ref, o_ref, *,
                              ne_pad, ni_pad):
    """grid = (batch_tiles,). Weights are VMEM-resident (constant index maps),
    so the whole forward for one batch tile is computed directly into o_ref —
    no fp32 accumulator scratch, no init step."""
    acc = jnp.dot(x_ref[...], wcomb_ref[...],
                  preferred_element_type=jnp.float32)          # (tb, ne_pad+ni_pad)
    hex_ = acc[:, :ne_pad]
    hi = acc[:, ne_pad:ne_pad + ni_pad]
    hei = jnp.dot(jnp.maximum(hi, 0.0).astype(weiT_ref.dtype), weiT_ref[...],
                  preferred_element_type=jnp.float32)          # (tb, ne_pad)
    o_ref[...] = (hex_ - hei + b_ref[...]).astype(o_ref.dtype)


def _ei_dense_stream_kernel(x_ref, wcomb_ref, weiT_ref, b_ref, o_ref, acc_ref, *,
                            ne_pad, ni_pad):
    """grid = (batch_tiles, k_tiles). Used only when the fused weight slab does
    not fit VMEM. Note: weight HBM traffic scales with the number of batch
    tiles in this regime (arithmetic intensity = 2*tb FLOP/byte)."""
    k = pl.program_id(1)

    @pl.when(k == 0)
    def _init():
        acc_ref[...] = jnp.zeros_like(acc_ref)

    # Fused first stage: one wide MXU pass covers both hex and hi.
    acc_ref[...] += jnp.dot(x_ref[...], wcomb_ref[...],
                            preferred_element_type=jnp.float32)

    @pl.when(k == pl.num_programs(1) - 1)
    def _finalize():
        hex_ = acc_ref[:, :ne_pad]
        hi = acc_ref[:, ne_pad:ne_pad + ni_pad]
        hei = jnp.dot(jnp.maximum(hi, 0.0).astype(weiT_ref.dtype), weiT_ref[...],
                      preferred_element_type=jnp.float32)
        o_ref[...] = (hex_ - hei + b_ref[...]).astype(o_ref.dtype)


# ----------------------------------------------------------------------------
# Hoisted weight preparation (called once; cached across forward calls)
# ----------------------------------------------------------------------------
def prepare_ei_dense_params(Wex, Wix, Wei, bias, *, compute_dtype=jnp.float32,
                            tb_target=256, tk_target=512, force_streaming=False):
    """Fuse / transpose / pad / cast the weights once and decide the kernel
    geometry (resident vs. streaming, K tiling).  Wex: (ne, n_in);
    Wix: (ni, n_in); Wei: (ne, ni); bias: (ne, 1)."""
    Wex = jnp.asarray(Wex)
    Wix = jnp.asarray(Wix)
    Wei = jnp.asarray(Wei)
    bias = jnp.asarray(bias)

    ne, n_in = Wex.shape
    ni = Wix.shape[0]
    c_sz = jnp.dtype(compute_dtype).itemsize

    ne_pad = _round_up(ne, 128)
    ni_pad = _round_up(max(ni, 1), 128)
    nc_pad = ne_pad + ni_pad
    n_in_128 = _round_up(n_in, 128)

    budget, phys = _vmem_budget()

    # --- residency decision: can the fused weights live in VMEM? -----------
    # Constant-index blocks are still double-buffered by the pipeline -> 2x.
    weights_vmem = 2 * (n_in_128 * nc_pad * c_sz
                        + ni_pad * ne_pad * c_sz
                        + ne_pad * 4)
    tile_vmem = (2 * tb_target * n_in_128 * c_sz       # x tile
                 + 2 * tb_target * ne_pad * 4          # out tile (worst case f32)
                 + 2 * tb_target * nc_pad * 4)         # live fp32 values
    resident = (not force_streaming) and (weights_vmem + tile_vmem <= budget)

    if resident:
        tk, nkt, n_in_pad = n_in_128, 1, n_in_128
    else:
        # Pick tile COUNT first, then size, to minimize K padding waste.
        nkt = max(2, _cdiv(n_in_128, tk_target)) if n_in_128 >= 256 else 1
        tk = _round_up(_cdiv(n_in_128, nkt), 128)
        nkt = _cdiv(n_in_128, tk)
        n_in_pad = tk * nkt

    # --- fused, padded, cast operands (zeros contribute nothing) -----------
    w_comb = jnp.zeros((n_in_pad, nc_pad), dtype=compute_dtype)
    w_comb = w_comb.at[:n_in, :ne].set(Wex.T.astype(compute_dtype))
    w_comb = w_comb.at[:n_in, ne_pad:ne_pad + ni].set(Wix.T.astype(compute_dtype))

    weiT = jnp.zeros((ni_pad, ne_pad), dtype=compute_dtype)
    weiT = weiT.at[:ni, :ne].set(Wei.T.astype(compute_dtype))

    b_row = jnp.zeros((1, ne_pad), dtype=jnp.float32)
    b_row = b_row.at[:, :ne].set(bias.reshape(1, ne).astype(jnp.float32))

    return dict(
        w_comb=w_comb, weiT=weiT, b_row=b_row,
        n_in=n_in, ne=ne, ni=ni,
        ne_pad=ne_pad, ni_pad=ni_pad, n_in_pad=n_in_pad,
        tk=tk, nkt=nkt, resident=resident,
        vmem_budget=budget, vmem_phys=phys,
    )


# ----------------------------------------------------------------------------
# Forward
# ----------------------------------------------------------------------------
def ei_dense_apply(x, params, *, tb_target=256):
    """x: (B, n_input). Returns (B, ne) in x.dtype."""
    w_comb, weiT, b_row = params["w_comb"], params["weiT"], params["b_row"]
    ne, ni, n_in = params["ne"], params["ni"], params["n_in"]
    ne_pad, ni_pad = params["ne_pad"], params["ni_pad"]
    n_in_pad, tk, nkt = params["n_in_pad"], params["tk"], params["nkt"]
    resident = params["resident"]
    budget, phys = params["vmem_budget"], params["vmem_phys"]

    B, n_in_x = x.shape
    assert n_in_x == n_in, f"expected n_input={n_in}, got {n_in_x}"
    nc_pad = ne_pad + ni_pad
    compute_dtype = w_comb.dtype
    out_dtype = x.dtype
    c_sz = jnp.dtype(compute_dtype).itemsize
    o_sz = jnp.dtype(out_dtype).itemsize

    # Streaming regime: weight-stream intensity is 2*tb FLOP/byte, so push the
    # batch tile toward 512 to approach the v6e/v7x roofline knee.
    if not resident:
        tb_target = max(tb_target, 512)

    # --- batch geometry: tile count first, then size (cuts padding waste) ---
    nbt = max(1, _cdiv(B, tb_target))
    tb = _round_up(_cdiv(B, nbt), 8)
    # v7x has 2 TensorCores: keep >=2 tiles on the parallel axis when it is
    # free to do so (resident regime -> weights are DMA'd once regardless).
    if resident and nbt == 1 and B >= 16:
        nbt = 2
        tb = _round_up(_cdiv(B, nbt), 8)
    B_pad = nbt * tb

    # --- VMEM footprint estimate (shrink tb if needed) ----------------------
    def _est(tb_):
        const_blocks = 2 * (ni_pad * ne_pad * c_sz + ne_pad * 4)  # WeiT + bias
        out_blocks = 2 * tb_ * ne_pad * o_sz
        live_f32 = tb_ * nc_pad * 4 + tb_ * ne_pad * 4
        if resident:
            return (2 * tb_ * n_in_pad * c_sz           # x tile
                    + 2 * n_in_pad * nc_pad * c_sz      # resident fused weights
                    + const_blocks + out_blocks + live_f32)
        return (2 * tb_ * tk * c_sz                      # x tile
                + 2 * tk * nc_pad * c_sz                 # streamed weight slab
                + const_blocks + out_blocks
                + tb_ * nc_pad * 4                       # fp32 accumulator scratch
                + tb_ * ne_pad * 4)                      # hei temp in finalize

    while _est(tb) > budget and tb > 8:
        tb = max(8, _round_up(tb // 2, 8))
        nbt = _cdiv(B, tb)
        B_pad = nbt * tb

    est = _est(tb)
    vmem_limit = int(min(max(est * 1.25 + (2 << 20), 32 << 20), budget))
    if est > budget:  # pathological shapes: ask for more, stay under physical
        vmem_limit = int(min(est * 1.1 + (2 << 20), phys - (4 << 20)))

    # --- pad x (the only per-call re-layout left) ----------------------------
    x_p = jnp.zeros((B_pad, n_in_pad), dtype=compute_dtype)
    x_p = x_p.at[:B, :n_in].set(x.astype(compute_dtype))

    flops = 2 * B_pad * n_in_pad * nc_pad + 2 * B_pad * ni_pad * ne_pad
    weight_reads = 1 if resident else nbt
    cost = pl.CostEstimate(
        flops=flops,
        transcendentals=0,
        bytes_accessed=int(x_p.size * c_sz
                           + w_comb.size * c_sz * weight_reads
                           + weiT.size * c_sz + b_row.size * 4
                           + B_pad * ne_pad * o_sz),
    )

    if resident:
        kernel = functools.partial(_ei_dense_resident_kernel,
                                   ne_pad=ne_pad, ni_pad=ni_pad)
        grid_spec = pltpu.PrefetchScalarGridSpec(
            num_scalar_prefetch=0,
            grid=(nbt,),
            in_specs=[
                pl.BlockSpec((tb, n_in_pad), lambda i: (i, 0)),       # x tile
                pl.BlockSpec((n_in_pad, nc_pad), lambda i: (0, 0)),   # [WexT|WixT] resident
                pl.BlockSpec((ni_pad, ne_pad), lambda i: (0, 0)),     # WeiT resident
                pl.BlockSpec((1, ne_pad), lambda i: (0, 0)),          # bias row
            ],
            out_specs=pl.BlockSpec((tb, ne_pad), lambda i: (i, 0)),
            scratch_shapes=[],
        )
        dim_sem = ("parallel",)
    else:
        kernel = functools.partial(_ei_dense_stream_kernel,
                                   ne_pad=ne_pad, ni_pad=ni_pad)
        grid_spec = pltpu.PrefetchScalarGridSpec(
            num_scalar_prefetch=0,
            grid=(nbt, nkt),
            in_specs=[
                pl.BlockSpec((tb, tk), lambda i, k: (i, k)),          # x tile
                pl.BlockSpec((tk, nc_pad), lambda i, k: (k, 0)),      # streamed weights
                pl.BlockSpec((ni_pad, ne_pad), lambda i, k: (0, 0)),  # WeiT
                pl.BlockSpec((1, ne_pad), lambda i, k: (0, 0)),       # bias row
            ],
            out_specs=pl.BlockSpec((tb, ne_pad), lambda i, k: (i, 0)),
            scratch_shapes=[pltpu.VMEM((tb, nc_pad), jnp.float32)],
        )
        dim_sem = ("parallel", "arbitrary")

    out_padded = pl.pallas_call(
        kernel,
        out_shape=jax.ShapeDtypeStruct((B_pad, ne_pad), out_dtype),
        grid_spec=grid_spec,
        compiler_params=pltpu.CompilerParams(
            dimension_semantics=dim_sem,
            vmem_limit_bytes=vmem_limit,
        ),
        cost_estimate=cost,
    )(x_p, w_comb, weiT, b_row)

    return out_padded[:B, :ne]


def ei_dense_forward(x, Wex, Wix, Wei, bias, *, compute_dtype=jnp.float32,
                     tb_target=256, tk_target=512):
    """One-shot convenience wrapper. For repeated calls, use
    prepare_ei_dense_params once and ei_dense_apply per step (the weight
    re-layout is then hoisted out of the steady-state path)."""
    params = prepare_ei_dense_params(Wex, Wix, Wei, bias,
                                     compute_dtype=compute_dtype,
                                     tb_target=tb_target, tk_target=tk_target)
    return ei_dense_apply(x, params, tb_target=tb_target)


# ----------------------------------------------------------------------------
# Reference + deterministic init (replicates the module's init_weights)
# ----------------------------------------------------------------------------
def init_ei_weights(n_input, ne, ni, numerator=2, k=1, seed=0):
    rng = np.random.default_rng(seed)

    def calc_ln_mu_sigma(mean, var):
        mu_ln = np.log(mean ** 2 / np.sqrt(mean ** 2 + var))
        sigma_ln = np.sqrt(np.log(1 + var / mean ** 2))
        return mu_ln, sigma_ln

    target_std_wex = np.sqrt(numerator * ne / (n_input * (ne - 1)))
    mu, sigma = calc_ln_mu_sigma(target_std_wex * k, target_std_wex ** 2)
    Wex = rng.lognormal(mu, sigma, size=(ne, n_input)).astype(np.float32)
    Wei = rng.lognormal(mu, sigma, size=(ne, ni)).astype(np.float32)
    Wei /= Wei.sum(axis=1, keepdims=True)
    Wix = (np.ones((ni, 1)) * Wex.mean(axis=0, keepdims=True)).astype(np.float32)
    bias = np.zeros((ne, 1), dtype=np.float32)   # use_bias=True, split_bias=False
    return Wex, Wix, Wei, bias


def ei_dense_ref(x, Wex, Wix, Wei, bias):
    hex_ = x @ Wex.T
    hi = x @ Wix.T
    hei = jnp.maximum(hi, 0.0) @ Wei.T
    return hex_ - hei + bias.T


if __name__ == "__main__":
    # --- case 1: tiny shape, resident-weights (single-pass) path, fp32 ------
    B, n_input, ne, ni = 8, 32, 32, 4
    Wex_np, Wix_np, Wei_np, bias_np = init_ei_weights(n_input, ne, ni, seed=0)
    Wex, Wix, Wei, bias = map(jnp.asarray, (Wex_np, Wix_np, Wei_np, bias_np))
    x = jax.random.normal(jax.random.PRNGKey(0), (B, n_input), dtype=jnp.float32)

    ref = ei_dense_ref(x, Wex, Wix, Wei, bias)
    params = prepare_ei_dense_params(Wex, Wix, Wei, bias, compute_dtype=jnp.float32)
    out = jax.block_until_ready(ei_dense_apply(x, params))
    np.testing.assert_allclose(np.asarray(out), np.asarray(ref),
                               rtol=1e-3, atol=1e-3)

    # --- case 2: forced K-tiled streaming path (exercises the accumulator) --
    B2, n_in2, ne2, ni2 = 16, 384, 64, 8
    Wex2_np, Wix2_np, Wei2_np, bias2_np = init_ei_weights(n_in2, ne2, ni2, seed=1)
    Wex2, Wix2, Wei2, bias2 = map(jnp.asarray, (Wex2_np, Wix2_np, Wei2_np, bias2_np))
    x2 = jax.random.normal(jax.random.PRNGKey(1), (B2, n_in2), dtype=jnp.float32)

    ref2 = ei_dense_ref(x2, Wex2, Wix2, Wei2, bias2)
    params2 = prepare_ei_dense_params(Wex2, Wix2, Wei2, bias2,
                                      compute_dtype=jnp.float32,
                                      tk_target=128, force_streaming=True)
    out2 = jax.block_until_ready(ei_dense_apply(x2, params2))
    np.testing.assert_allclose(np.asarray(out2), np.asarray(ref2),
                               rtol=1e-3, atol=1e-3)

    # --- case 3: opt-in bf16 fast path (fp32 accumulation, loose tolerance) -
    params_bf16 = prepare_ei_dense_params(Wex, Wix, Wei, bias,
                                          compute_dtype=jnp.bfloat16)
    out_bf16 = jax.block_until_ready(ei_dense_apply(x, params_bf16))
    np.testing.assert_allclose(np.asarray(out_bf16), np.asarray(ref),
                               rtol=5e-2, atol=5e-2)

    print("KERNEL_OK")
</pallas_src>

<mosaic_0001>
module attributes {stable_mosaic.version = 11 : i64} {
  func.func @_ei_dense_resident_kernel(%arg0: i32, %arg1: memref<8x128xf32, #tpu.memory_space<vmem>>, %arg2: memref<128x256xf32, #tpu.memory_space<vmem>>, %arg3: memref<128x128xf32, #tpu.memory_space<vmem>>, %arg4: memref<1x128xf32, #tpu.memory_space<vmem>>, %arg5: memref<8x128xf32, #tpu.memory_space<vmem>>) attributes {dimension_semantics = [#tpu.dimension_semantics<parallel>], iteration_bounds = array<i64: 1>, scalar_prefetch = 0 : i64, scratch_operands = 0 : i64, tpu.core_type = #tpu.core_type<tc>, window_params = [{transform_indices = @transform_0, window_bounds = array<i64: 8, 128>}, {pipeline_mode = #tpu.pipeline_mode<synchronous>, transform_indices = @transform_1, window_bounds = array<i64: 128, 256>}, {pipeline_mode = #tpu.pipeline_mode<synchronous>, transform_indices = @transform_2, window_bounds = array<i64: 128, 128>}, {pipeline_mode = #tpu.pipeline_mode<synchronous>, transform_indices = @transform_3, window_bounds = array<i64: 1, 128>}, {transform_indices = @transform_4, window_bounds = array<i64: 8, 128>}]} {
    %c0 = arith.constant 0 : index
    %c0_0 = arith.constant 0 : index
    %0 = vector.load %arg1[%c0, %c0_0] : memref<8x128xf32, #tpu.memory_space<vmem>>, vector<8x128xf32>
    %c0_1 = arith.constant 0 : index
    %c0_2 = arith.constant 0 : index
    %1 = vector.load %arg2[%c0_1, %c0_2] : memref<128x256xf32, #tpu.memory_space<vmem>>, vector<128x256xf32>
    %cst = arith.constant dense<0.000000e+00> : vector<8x256xf32>
    %2 = tpu.matmul %0, %1, %cst {dimension_numbers = #tpu.dot_dimension_numbers<[1], [0], [0], [1], [0, 0, 1, 1], [], []>} : vector<8x128xf32>, vector<128x256xf32>, vector<8x256xf32> -> vector<8x256xf32>
    %3 = vector.extract_strided_slice %2 {offsets = [0, 0], sizes = [8, 128], strides = [1, 1]} : vector<8x256xf32> to vector<8x128xf32>
    %4 = vector.extract_strided_slice %2 {offsets = [0, 128], sizes = [8, 128], strides = [1, 1]} : vector<8x256xf32> to vector<8x128xf32>
    %cst_3 = arith.constant 0.000000e+00 : f32
    %5 = vector.broadcast %cst_3 : f32 to vector<8x128xf32>
    %6 = arith.maximumf %4, %5 : vector<8x128xf32>
    %c0_4 = arith.constant 0 : index
    %c0_5 = arith.constant 0 : index
    %7 = vector.load %arg3[%c0_4, %c0_5] : memref<128x128xf32, #tpu.memory_space<vmem>>, vector<128x128xf32>
    %cst_6 = arith.constant dense<0.000000e+00> : vector<8x128xf32>
    %8 = tpu.matmul %6, %7, %cst_6 {dimension_numbers = #tpu.dot_dimension_numbers<[1], [0], [0], [1], [0, 0, 1, 1], [], []>} : vector<8x128xf32>, vector<128x128xf32>, vector<8x128xf32> -> vector<8x128xf32>
    %9 = arith.subf %3, %8 : vector<8x128xf32>
    %c0_7 = arith.constant 0 : index
    %c0_8 = arith.constant 0 : index
    %10 = vector.load %arg4[%c0_7, %c0_8] : memref<1x128xf32, #tpu.memory_space<vmem>>, vector<1x128xf32>
    %11 = vector.broadcast %10 : vector<1x128xf32> to vector<8x128xf32>
    %12 = arith.addf %9, %11 : vector<8x128xf32>
    %c0_9 = arith.constant 0 : index
    %c0_10 = arith.constant 0 : index
    %13 = vector.load %arg5[%c0_9, %c0_10] : memref<8x128xf32, #tpu.memory_space<vmem>>, vector<8x128xf32>
    tpu.vector_store %arg5[%c0_9, %c0_10], %12 {strides = array<i32>} : memref<8x128xf32, #tpu.memory_space<vmem>>, vector<8x128xf32>,
    return
  }
  func.func @transform_0(%arg0: i32) -> (i32, i32) {
    %c0_i32 = arith.constant 0 : i32
    %c0_i32_0 = arith.constant 0 : i32
    return %arg0, %c0_i32 : i32, i32
  }
  func.func @transform_1(%arg0: i32) -> (i32, i32) {
    %c0_i32 = arith.constant 0 : i32
    %c0_i32_0 = arith.constant 0 : i32
    %c0_i32_1 = arith.constant 0 : i32
    return %c0_i32, %c0_i32_0 : i32, i32
  }
  func.func @transform_2(%arg0: i32) -> (i32, i32) {
    %c0_i32 = arith.constant 0 : i32
    %c0_i32_0 = arith.constant 0 : i32
    %c0_i32_1 = arith.constant 0 : i32
    return %c0_i32, %c0_i32_0 : i32, i32
  }
  func.func @transform_3(%arg0: i32) -> (i32, i32) {
    %c0_i32 = arith.constant 0 : i32
    %c0_i32_0 = arith.constant 0 : i32
    %c0_i32_1 = arith.constant 0 : i32
    return %c0_i32, %c0_i32_0 : i32, i32
  }
  func.func @transform_4(%arg0: i32) -> (i32, i32) {
    %c0_i32 = arith.constant 0 : i32
    %c0_i32_0 = arith.constant 0 : i32
    return %arg0, %c0_i32 : i32, i32
  }
}

</mosaic_0001>

<bundles_post_ra>
// kernel: tpu_custom_call.1
= control target key start
LH: loop header
LB: loop body
LE: loop exit
PB: predicated region body
PF: predicated region fallthrough
CT: control target
= control target key end

     0   :  { %9 = vsyncpa [#allocation3], 0  ;;  %s357_s0 = inlined_call_operand.hbm [shape: f32[8,128], index: 0, kind: input, shape index: {}]   ;;  %s358_s1 = inlined_call_operand.hbm [shape: f32[128,256], index: 1, kind: input, shape index: {}]   ;;  %s359_s2 = inlined_call_operand.hbm [shape: f32[128,128], index: 2, kind: input, shape index: {}]   ;;  %s360_s3 = inlined_call_operand.vmem [shape: f32[1,128], index: 3, kind: input, shape index: {}]   ;;  %s361_s4 = inlined_call_operand.hbm [shape: f32[8,128], index: 4, kind: output, shape index: {}]  }
   0x1   :  { %10 = vsyncpa [#allocation6], 0  ;;  %s27_s17 = sshll.u32 %s358_s1, 4  ;;  %s28_s17 = int_to_ptr.hbm [resolvable:$true] %s27_s17 }
   0x2   :  { %11 = vsyncpa [#allocation4], 0  ;;  %s309_s18 = smov [#allocation5]   ;;  %s17_s22 = sshll.u32 %s357_s0, 4  ;;  %s18_s22 = int_to_ptr.hbm [resolvable:$true] %s17_s22 }
   0x3   :  { %s29_s19 = sshll.u32 %s309_s18, 4  ;;  %s310_s23 = smov 256   ;;  %s30_s19 = int_to_ptr.vmem [resolvable:$true] %s29_s19 }
   0x4   :  { %s311_s24 = smov 16   ;;  %s312_s25 = smov [#allocation2]  }
   0x5   :  { %35 = dma.hbm_to_vmem [thread:$0]  %s28_s17, 4096, %s30_s19, [#allocation6], %s310_s23, %s310_s23, %s311_s24  }
   0x6   :  { %s19_s26 = sshll.u32 %s312_s25, 4  ;;  %s40_s29 = sshll.u32 %s359_s2, 4  ;;  %s20_s26 = int_to_ptr.vmem [resolvable:$true] %s19_s26  ;;  %s41_s29 = int_to_ptr.hbm [resolvable:$true] %s40_s29 }
   0x7   :  { %22 = dma.hbm_to_vmem [thread:$0]  %s18_s22, 128, %s20_s26, [#allocation3]  }
   0x8   :  { %s313_s1 = smov [#allocation7]   ;;  %s314_s5 = smov 128  }
   0x9   :  { %s42_s30 = sshll.u32 %s313_s1, 4  ;;  %s315_s6 = smov 8   ;;  %s43_s30 = int_to_ptr.vmem [resolvable:$true] %s42_s30 }
   0xa   :  { %48 = dma.hbm_to_vmem [thread:$0]  %s41_s29, 2048, %s43_s30, [#allocation6], %s314_s5, %s314_s5, %s315_s6  }
   0xb   :  { %303 = dma.done.wait [#allocation3], 128  }
   0xc   :  { %304 = vsyncadd [#allocation3], 4294967168 }
   0xd   :  { %305 = dma.done.wait [#allocation6], 6144  }
   0xe   :  { %306 = vsyncadd [#allocation6], 4294961152  ;;  %v95_v0 = vld [vmem:[#allocation5 + $0xf8] sm:$0xff]  ;;  %v93_v1 = vld [vmem:[#allocation5 + $0xe8] sm:$0xff]  ;;  %s316_s7 = smov [#allocation8]   ;;  %s187_s11 = sshll.u32 %s361_s4, 4  ;;  %s188_s11 = int_to_ptr.hbm [resolvable:$true] %s187_s11 }
   0xf   :  { %116 = vmatpush.msra.mxu1 %v95_v0  ;;  %v91_v2 = vld [vmem:[#allocation5 + $0xd8] sm:$0xff]  ;;  %v89_v3 = vld [vmem:[#allocation5 + $0xc8] sm:$0xff]  ;;  %v151_v6 = vld [vmem:[#allocation7 + $0x70] sm:$0xff]  ;;  %s185_s8 = sshll.u32 %s316_s7, 4  ;;  %s186_s8 = int_to_ptr.vmem [resolvable:$true] %s185_s8 }
  0x10   :  { %v152_v4 = vld [vmem:[#allocation7 + $0x78] sm:$0xff]  ;;  %v94_v7 = vld [vmem:[#allocation5 + $0xf0] sm:$0xff]  ;;  %v150_v8 = vld [vmem:[#allocation7 + $0x68] sm:$0xff] }
  0x11   :  { %117 = vmatpush.msra.mxu1 %v93_v1  ;;  %v87_v5 = vld [vmem:[#allocation5 + $0xb8] sm:$0xff]  ;;  %153 = vmatpush.msra.mxu2 %v152_v4  ;;  %v92_v9 = vld [vmem:[#allocation5 + $0xe0] sm:$0xff]  ;;  %v85_v10 = vld [vmem:[#allocation5 + $0xa8] sm:$0xff] }
  0x12   :  { %96 = vmatpush.msra.mxu0 %v94_v7  ;;  %v90_v11 = vld [vmem:[#allocation5 + $0xd0] sm:$0xff]  ;;  %v149_v12 = vld [vmem:[#allocation7 + $0x60] sm:$0xff]  ;;  %v83_v13 = vld [vmem:[#allocation5 + $0x98] sm:$0xff] }
  0x13   :  { %118 = vmatpush.msra.mxu1 %v91_v2  ;;  %154 = vmatpush.msra.mxu2 %v151_v6  ;;  %v88_v14 = vld [vmem:[#allocation5 + $0xc0] sm:$0xff]  ;;  %v148_v15 = vld [vmem:[#allocation7 + $0x58] sm:$0xff]  ;;  %v81_v16 = vld [vmem:[#allocation5 + $0x88] sm:$0xff] }
  0x14   :  { %97 = vmatpush.msra.mxu0 %v92_v9  ;;  %v86_v17 = vld [vmem:[#allocation5 + $0xb0] sm:$0xff]  ;;  %v79_v19 = vld [vmem:[#allocation5 + $0x78] sm:$0xff]  ;;  %v84_v20 = vld [vmem:[#allocation5 + $0xa0] sm:$0xff] }
  0x15   :  { %119 = vmatpush.msra.mxu1 %v89_v3  ;;  %155 = vmatpush.msra.mxu2 %v150_v8  ;;  %v147_v18 = vld [vmem:[#allocation7 + $0x50] sm:$0xff]  ;;  %v146_v21 = vld [vmem:[#allocation7 + $0x48] sm:$0xff]  ;;  %v145_v24 = vld [vmem:[#allocation7 + $0x40] sm:$0xff] }
  0x16   :  { %98 = vmatpush.msra.mxu0 %v90_v11  ;;  %v77_v22 = vld [vmem:[#allocation5 + $0x68] sm:$0xff]  ;;  %v82_v23 = vld [vmem:[#allocation5 + $0x90] sm:$0xff]  ;;  %v75_v25 = vld [vmem:[#allocation5 + $0x58] sm:$0xff] }
  0x17   :  { %120 = vmatpush.msra.mxu1 %v87_v5  ;;  %156 = vmatpush.msra.mxu2 %v149_v12  ;;  %v80_v26 = vld [vmem:[#allocation5 + $0x80] sm:$0xff]  ;;  %v144_v27 = vld [vmem:[#allocation7 + $0x38] sm:$0xff]  ;;  %v73_v28 = vld [vmem:[#allocation5 + $0x48] sm:$0xff] }
  0x18   :  { %99 = vmatpush.msra.mxu0 %v88_v14  ;;  %v78_v29 = vld [vmem:[#allocation5 + $0x70] sm:$0xff]  ;;  %v71_v31 = vld [vmem:[#allocation5 + $0x38] sm:$0xff]  ;;  %v76_v32 = vld [vmem:[#allocation5 + $0x60] sm:$0xff] }
  0x19   :  { %121 = vmatpush.msra.mxu1 %v85_v10  ;;  %157 = vmatpush.msra.mxu2 %v148_v15  ;;  %v143_v30 = vld [vmem:[#allocation7 + $0x30] sm:$0xff]  ;;  %v142_v33 = vld [vmem:[#allocation7 + $0x28] sm:$0xff]  ;;  %v141_v36 = vld [vmem:[#allocation7 + $0x20] sm:$0xff] }
  0x1a   :  { %100 = vmatpush.msra.mxu0 %v86_v17  ;;  %v69_v34 = vld [vmem:[#allocation5 + $0x28] sm:$0xff]  ;;  %v74_v35 = vld [vmem:[#allocation5 + $0x50] sm:$0xff]  ;;  %v67_v37 = vld [vmem:[#allocation5 + $0x18] sm:$0xff] }
  0x1b   :  { %122 = vmatpush.msra.mxu1 %v83_v13  ;;  %158 = vmatpush.msra.mxu2 %v147_v18  ;;  %v72_v38 = vld [vmem:[#allocation5 + $0x40] sm:$0xff]  ;;  %v140_v39 = vld [vmem:[#allocation7 + $0x18] sm:$0xff]  ;;  %v65_v40 = vld [vmem:[#allocation5 + $0x8] sm:$0xff] }
  0x1c   :  { %101 = vmatpush.msra.mxu0 %v84_v20  ;;  %v63_v41 = vld [vmem:[#allocation2] sm:$0xff]  ;;  %v139_v42 = vld [vmem:[#allocation7 + $0x10] sm:$0xff]  ;;  %v138_v43 = vld [vmem:[#allocation7 + $0x8] sm:$0xff] }
  0x1d   :  { %123 = vmatpush.msra.mxu1 %v81_v16  ;;  %159 = vmatpush.msra.mxu2 %v146_v21  ;;  %v70_v44 = vld [vmem:[#allocation5 + $0x30] sm:$0xff]  ;;  %v137_v45 = vld [vmem:[#allocation7] sm:$0xff]  ;;  %v206_v52 = vld [vmem:[%s360_s3] ss:$0 sm:$0xff] }
  0x1e   :  { %102 = vmatpush.msra.mxu0 %v82_v23  ;;  %v68_v46 = vld [vmem:[#allocation5 + $0x20] sm:$0xff]  ;;  %v66_v47 = vld [vmem:[#allocation5 + $0x10] sm:$0xff] }
  0x1f   :  { %124 = vmatpush.msra.mxu1 %v79_v19  ;;  %160 = vmatpush.msra.mxu2 %v145_v24  ;;  %v64_v48 = vld [vmem:[#allocation5] sm:$0xff] }
  0x20   :  { %103 = vmatpush.msra.mxu0 %v80_v26 }
  0x21   :  { %125 = vmatpush.msra.mxu1 %v77_v22  ;;  %161 = vmatpush.msra.mxu2 %v144_v27 }
  0x22   :  { %104 = vmatpush.msra.mxu0 %v78_v29 }
  0x23   :  { %126 = vmatpush.msra.mxu1 %v75_v25  ;;  %162 = vmatpush.msra.mxu2 %v143_v30 }
  0x24   :  { %105 = vmatpush.msra.mxu0 %v76_v32 }
  0x25   :  { %127 = vmatpush.msra.mxu1 %v73_v28  ;;  %163 = vmatpush.msra.mxu2 %v142_v33 }
  0x26   :  { %106 = vmatpush.msra.mxu0 %v74_v35 }
  0x27   :  { %128 = vmatpush.msra.mxu1 %v71_v31  ;;  %164 = vmatpush.msra.mxu2 %v141_v36 }
  0x28   :  { %107 = vmatpush.msra.mxu0 %v72_v38 }
  0x29   :  { %129 = vmatpush.msra.mxu1 %v69_v34  ;;  %165 = vmatpush.msra.mxu2 %v140_v39 }
  0x2a   :  { %108 = vmatpush.msra.mxu0 %v70_v44 }
  0x2b   :  { %130 = vmatpush.msra.mxu1 %v67_v37  ;;  %166 = vmatpush.msra.mxu2 %v139_v42 }
  0x2c   :  { %109 = vmatpush.msra.mxu0 %v68_v46 }
  0x2d   :  { %131 = vmatpush.msra.mxu1 %v65_v40  ;;  %167 = vmatpush.msra.mxu2 %v138_v43 }
  0x2e   :  { %132 = vmatmul.f32.vlgmr.msra.gmra.mxu1 %v63_v41  ;;  %110 = vmatpush.msra.mxu0 %v66_v47 }
  0x2f   :  { %168 = vmatpush.msra.mxu2 %v137_v45 }
  0x30   :  { %111 = vmatpush.msra.mxu0 %v64_v48 }
  0x31   :  { %112 = vmatmul.f32.vlgmr.msra.gmra.mxu0 %v63_v41 }
  0xab   :  { %v133_v49 = vpop.f32.mrf.mxu1 }
  0xac   :  { %v136_v50 = vmax.f32 %v133_v49, 0.0 }
  0xae   :  { %169 = vmatmul.f32.vlgmr.msra.gmra.mxu2 %v136_v50  ;;  %v113_v51 = vpop.f32.mrf.mxu0 }
 0x131   :  { %v170_v53 = vpop.f32.mrf.mxu2 }
 0x132   :  { %v173_v54 = vsub.f32 %v113_v51, %v170_v53 }
 0x134   :  { %v178_v55 = vadd.f32 %v206_v52, %v173_v54 }
 0x136   :  { %179 = vst [vmem:[#allocation8] sm:$0xff] %v178_v55 }
 0x137   :  { %190 = dma.vmem_to_hbm [thread:$0]  %s186_s8, 128, %s188_s11, [#allocation4]  }
 0x138   :  { %307 = dma.done.wait [#allocation4], 128  }
 0x139   :  { %308 = vsyncadd [#allocation4], 4294967168 }
 0x13a   :  { %195 = vsyncpa [#allocation3], 1 }
 0x13b   :  { %196 = vsyncpa [#allocation6], 1 }
 0x13c   :  { %197 = vsyncpa [#allocation4], 1 }

</bundles_post_ra>
